<compile_context>
chip_gen: v5e
topology: v5e:2x2
jax: 0.10.0
libtpu: 0.0.40
codegen_flags: <defaults>
</compile_context>

<pallas_src>
import jax
import jax.numpy as jnp
from jax.experimental import pallas as pl
from jax.experimental.pallas import tpu as pltpu


# ---------------------------------------------------------------------------
# Pallas kernel (feature-major: features on sublanes, tokens on lanes)
# ---------------------------------------------------------------------------
def narm_feat_kernel(
    feat_ref,    # (D,   TN) bf16  brand+material+author+color-avg pre-sum
    idtext_ref,  # (D+T, TN) bf16  [item_id emb ; frozen text vec] (one gather)
    price_ref,   # (1,   TN) f32
    wp1_ref,     # (D, 1)  f32   linear_price weight (transposed)
    wt1_ref,     # (D, T)  bf16  item_text_mlp layer-1 weight (transposed)
    bt1_ref,     # (D, 1)  f32   item_text_mlp layer-1 bias (transposed)
    wf1_ref,     # (D, D)  bf16  feat slice of feat_id_mlp weight (transposed)
    wf3_ref,     # (D, D)  bf16  id   slice of feat_id_mlp weight (transposed)
    ap_ref,      # (D, D)  bf16  (wp2 @ Wf1)^T  price path folded weight
    at_ref,      # (D, D)  bf16  (wt2 @ Wf2)^T  text  path folded weight
    bias_ref,    # (D, 1)  f32   (bf + bt2 @ Wf2)^T
    out_ref,     # (D, TN) bf16
):
    D = feat_ref.shape[0]

    idtext = idtext_ref[...]          # (D+T, TN); static slices are free
    id_e = idtext[:D]                 # (D, TN) item-id embeddings
    text = idtext[D:]                 # (T, TN) frozen text vectors

    # --- price branch (VPU): ReLU(wp1^T * price) outer-product broadcast, f32.
    price_h = jnp.maximum(wp1_ref[...] * price_ref[...], 0.0)

    # --- text branch: ReLU(Wt1^T @ text + bt1^T), f32 accumulation on MXU.
    # TODO(synk): item_text_mlp dropout omitted (eval-mode identity).
    text_h = jnp.dot(wt1_ref[...], text, preferred_element_type=jnp.float32)
    text_h = jnp.maximum(text_h + bt1_ref[...], 0.0)

    # --- feat_id_concat linear (folded / split matmul, identical math) -------
    out = jnp.dot(wf1_ref[...], feat_ref[...], preferred_element_type=jnp.float32)
    out = out + jnp.dot(wf3_ref[...], id_e, preferred_element_type=jnp.float32)
    out = out + jnp.dot(ap_ref[...], price_h.astype(jnp.bfloat16),
                        preferred_element_type=jnp.float32)
    out = out + jnp.dot(at_ref[...], text_h.astype(jnp.bfloat16),
                        preferred_element_type=jnp.float32)
    out_ref[...] = (out + bias_ref[...]).astype(out_ref.dtype)


# ---------------------------------------------------------------------------
# One-time parameter preparation (transpose tables, fold weights, bf16 cast)
# ---------------------------------------------------------------------------
def prepare_encoder_params(params, embed_dim):
    D = embed_dim
    f32, bf16 = jnp.float32, jnp.bfloat16

    wf = params["wf"].astype(f32)                  # (3D, D), stored as (in, out)
    wf1, wf2, wf3 = wf[0:D], wf[D:2 * D], wf[2 * D:3 * D]
    # Fold in f32, cast to bf16 afterwards.
    ap = params["wp2"].astype(f32) @ wf1           # fold linear_price_2 into Wf1
    at = params["wt2"].astype(f32) @ wf2           # fold text layer-2 into Wf2
    bias = params["bf"][0].astype(f32) + params["bt2"][0].astype(f32) @ wf2

    return {
        # bf16 feature-major tables -> gathers produce lane-dense (rows, N) streams
        "brand_T":    params["brand_emb"].T.astype(bf16),
        "material_T": params["material_emb"].T.astype(bf16),
        "author_T":   params["author_emb"].T.astype(bf16),
        "color_T":    params["color_emb"].T.astype(bf16),
        # stacked [item ; text] table: ONE gather serves both streams
        "idtext_T": jnp.concatenate(
            [params["item_emb"].T, params["text_table"].T], axis=0).astype(bf16),
        # MXU weights in bf16 (feature-major)
        "wt1_T": params["wt1"].T.astype(bf16),                 # (D, T)
        "wf1_T": wf1.T.astype(bf16),                           # (D, D)
        "wf3_T": wf3.T.astype(bf16),                           # (D, D)
        "ap_T":  ap.T.astype(bf16),                            # (D, D)
        "at_T":  at.T.astype(bf16),                            # (D, D)
        # VPU-side vectors stay f32 (tiny; added to f32 accumulators)
        "wp1_T":  params["wp1"].T.astype(f32),                 # (D, 1)
        "bt1_T":  params["bt1"].T.astype(f32),                 # (D, 1)
        "bias_T": bias.reshape(D, 1).astype(f32),              # (D, 1)
    }


# ---------------------------------------------------------------------------
# Wrapper (glue: gathers, pre-sum, pallas_call)
# ---------------------------------------------------------------------------
def narm_feat_item_encoder(batch, enc, embed_dim, row_tile=8192):
    """batch holds the 'in_*' sequence fields; returns (B, L, D) bf16."""
    B, L = batch["in_item_id"].shape
    N = B * L
    D = embed_dim
    T = enc["idtext_T"].shape[0] - D

    ids = batch["in_item_id"].reshape(N)

    # Feature-major gathers; add/average in f32 inside the fusion, emit bf16.
    feat = (enc["brand_T"][:, batch["in_brand"].reshape(N)].astype(jnp.float32)
            + enc["material_T"][:, batch["in_material"].reshape(N)].astype(jnp.float32)
            + enc["author_T"][:, batch["in_author"].reshape(N)].astype(jnp.float32))
    color_idx = batch["in_color"].reshape(N, -1)                   # (N, C)
    cn = batch["in_color_num"].reshape(N).astype(jnp.float32)
    inv_cn = 1.0 / jnp.where(cn == 0.0, 1.0, cn)
    feat = feat + (enc["color_T"][:, color_idx].astype(jnp.float32).sum(axis=-1)
                   * inv_cn[None, :])
    feat_T = feat.astype(jnp.bfloat16)                             # (D, N)

    idtext_T = enc["idtext_T"][:, ids]                             # (D+T, N) bf16
    price_T = batch["in_price"].reshape(1, N).astype(jnp.float32)  # (1, N)

    # Token tile: lane-dense multiple of 128; last grid block may overrun
    # (no HBM pad — garbage lanes are column-local and clamped on write-back).
    tn = min(row_tile, ((N + 127) // 128) * 128)
    grid_n = pl.cdiv(N, tn)

    def stream_spec(rows):
        return pl.BlockSpec((rows, tn), lambda i: (0, i))

    def const_spec(shape):
        return pl.BlockSpec(shape, lambda i: (0, 0))      # weights DMA'd once

    flops = int(N) * 2 * D * (T + 4 * D)
    bytes_accessed = (int(N) * (2 * (2 * D + T) + 4 + 2 * D)   # streams + output
                      + 2 * (D * T + 4 * D * D) + 4 * 3 * D)   # weights

    out_T = pl.pallas_call(
        narm_feat_kernel,
        grid=(grid_n,),
        in_specs=[
            stream_spec(D),            # feat_T
            stream_spec(D + T),        # idtext_T
            stream_spec(1),            # price_T
            const_spec((D, 1)),        # wp1_T
            const_spec((D, T)),        # wt1_T
            const_spec((D, 1)),        # bt1_T
            const_spec((D, D)),        # wf1_T
            const_spec((D, D)),        # wf3_T
            const_spec((D, D)),        # ap_T
            const_spec((D, D)),        # at_T
            const_spec((D, 1)),        # bias_T
        ],
        out_specs=pl.BlockSpec((D, tn), lambda i: (0, i)),
        out_shape=jax.ShapeDtypeStruct((D, N), jnp.bfloat16),
        compiler_params=pltpu.CompilerParams(
            dimension_semantics=("parallel",),
            vmem_limit_bytes=32 * 1024 * 1024,
        ),
        cost_estimate=pl.CostEstimate(
            flops=flops, transcendentals=0, bytes_accessed=bytes_accessed),
    )(feat_T, idtext_T, price_T,
      enc["wp1_T"], enc["wt1_T"], enc["bt1_T"],
      enc["wf1_T"], enc["wf3_T"], enc["ap_T"], enc["at_T"], enc["bias_T"])

    # Layout change only for API parity with the PyTorch module; a downstream
    # consumer that accepts feature-major (D, N) bf16 should use out_T directly
    # and skip this HBM round trip.
    return out_T.T.reshape(B, L, D)


# ---------------------------------------------------------------------------
# Pure-JAX reference (mirrors the PyTorch forward, is_target=False branch)
# ---------------------------------------------------------------------------
def reference_forward(batch, params, embed_dim):
    id_e = params["item_emb"][batch["in_item_id"]]
    brand_e = params["brand_emb"][batch["in_brand"]]
    material_e = params["material_emb"][batch["in_material"]]
    author_e = params["author_emb"][batch["in_author"]]
    feat = brand_e + material_e + author_e

    price = batch["in_price"][..., None].astype(jnp.float32)           # (B, L, 1)
    price_h = jax.nn.relu(price * params["wp1"][0])                    # Linear(1, D)
    feat = feat + price_h @ params["wp2"]

    color_e = params["color_emb"][batch["in_color"]]                   # (B, L, C, D)
    cn = batch["in_color_num"].astype(jnp.float32)
    cn = jnp.where(cn == 0, 1.0, cn)
    feat = feat + color_e.sum(axis=-2) / cn[..., None]

    text_v = params["text_table"][batch["in_item_id"]]
    h = jax.nn.relu(text_v @ params["wt1"] + params["bt1"][0])
    text_emb = h @ params["wt2"] + params["bt2"][0]

    cat = jnp.concatenate([feat, text_emb, id_e], axis=-1)             # (B, L, 3D)
    return cat @ params["wf"] + params["bf"][0]


# ---------------------------------------------------------------------------
# Main
# ---------------------------------------------------------------------------
if __name__ == "__main__":
    B, L, D, C, T = 2, 8, 32, 4, 64
    NUM_ITEMS, NUM_BRAND, NUM_MATERIAL, NUM_AUTHOR, NUM_COLOR = 50, 20, 15, 25, 10

    key = jax.random.PRNGKey(0)
    ks = jax.random.split(key, 20)

    def emb_table(k, n, d):
        t = 0.1 * jax.random.normal(k, (n, d), dtype=jnp.float32)
        return t.at[0].set(0.0)  # padding_idx=0

    params = {
        "item_emb":     emb_table(ks[0], NUM_ITEMS, D),
        "brand_emb":    emb_table(ks[1], NUM_BRAND, D),
        "material_emb": emb_table(ks[2], NUM_MATERIAL, D),
        "author_emb":   emb_table(ks[3], NUM_AUTHOR, D),
        "color_emb":    emb_table(ks[4], NUM_COLOR, D),
        "text_table":   emb_table(ks[5], NUM_ITEMS, T),   # frozen text vectors
        # weights stored pre-transposed to (in, out)
        "wp1": 0.1 * jax.random.normal(ks[6], (1, D), dtype=jnp.float32),
        "wp2": 0.1 * jax.random.normal(ks[7], (D, D), dtype=jnp.float32),
        "wt1": 0.1 * jax.random.normal(ks[8], (T, D), dtype=jnp.float32),
        "bt1": 0.1 * jax.random.normal(ks[9], (1, D), dtype=jnp.float32),
        "wt2": 0.1 * jax.random.normal(ks[10], (D, D), dtype=jnp.float32),
        "bt2": 0.1 * jax.random.normal(ks[11], (1, D), dtype=jnp.float32),
        "wf":  0.1 * jax.random.normal(ks[12], (3 * D, D), dtype=jnp.float32),
        "bf":  0.1 * jax.random.normal(ks[13], (1, D), dtype=jnp.float32),
    }

    in_color = jax.random.randint(ks[17], (B, L, C), 0, NUM_COLOR, dtype=jnp.int32)
    batch = {
        "in_item_id":  jax.random.randint(ks[14], (B, L), 1, NUM_ITEMS, dtype=jnp.int32),
        "in_brand":    jax.random.randint(ks[15], (B, L), 0, NUM_BRAND, dtype=jnp.int32),
        "in_material": jax.random.randint(ks[16], (B, L), 0, NUM_MATERIAL, dtype=jnp.int32),
        "in_author":   jax.random.randint(ks[18], (B, L), 0, NUM_AUTHOR, dtype=jnp.int32),
        "in_color":    in_color,
        "in_color_num": (in_color != 0).sum(axis=-1).astype(jnp.int32),
        "in_price":    jax.random.uniform(ks[19], (B, L), dtype=jnp.float32),
    }

    enc = prepare_encoder_params(params, D)
    out = narm_feat_item_encoder(batch, enc, D)
    out = jax.block_until_ready(out)

    ref = jax.block_until_ready(reference_forward(batch, params, D))

    assert out.shape == (B, L, D), out.shape
    out_f32 = out.astype(jnp.float32)
    # bf16 streams/weights/output -> relaxed tolerance vs. the f32 reference.
    assert jnp.allclose(out_f32, ref, rtol=2e-2, atol=2e-2), (
        f"max abs err {jnp.max(jnp.abs(out_f32 - ref))}"
    )
    print("KERNEL_OK")
</pallas_src>

<mosaic_0001>
module attributes {stable_mosaic.version = 11 : i64} {
  func.func @narm_feat_kernel(%arg0: i32, %arg1: memref<32x128xbf16, #tpu.memory_space<vmem>>, %arg2: memref<96x128xbf16, #tpu.memory_space<vmem>>, %arg3: memref<1x128xf32, #tpu.memory_space<vmem>>, %arg4: memref<32x1xf32, #tpu.memory_space<vmem>>, %arg5: memref<32x64xbf16, #tpu.memory_space<vmem>>, %arg6: memref<32x1xf32, #tpu.memory_space<vmem>>, %arg7: memref<32x32xbf16, #tpu.memory_space<vmem>>, %arg8: memref<32x32xbf16, #tpu.memory_space<vmem>>, %arg9: memref<32x32xbf16, #tpu.memory_space<vmem>>, %arg10: memref<32x32xbf16, #tpu.memory_space<vmem>>, %arg11: memref<32x1xf32, #tpu.memory_space<vmem>>, %arg12: memref<32x128xbf16, #tpu.memory_space<vmem>>) attributes {dimension_semantics = [#tpu.dimension_semantics<parallel>], iteration_bounds = array<i64: 1>, scalar_prefetch = 0 : i64, scratch_operands = 0 : i64, tpu.core_type = #tpu.core_type<tc>, window_params = [{transform_indices = @transform_0, window_bounds = array<i64: 32, 128>}, {transform_indices = @transform_1, window_bounds = array<i64: 96, 128>}, {transform_indices = @transform_2, window_bounds = array<i64: 1, 128>}, {pipeline_mode = #tpu.pipeline_mode<synchronous>, transform_indices = @transform_3, window_bounds = array<i64: 32, 1>}, {pipeline_mode = #tpu.pipeline_mode<synchronous>, transform_indices = @transform_4, window_bounds = array<i64: 32, 64>}, {pipeline_mode = #tpu.pipeline_mode<synchronous>, transform_indices = @transform_5, window_bounds = array<i64: 32, 1>}, {pipeline_mode = #tpu.pipeline_mode<synchronous>, transform_indices = @transform_6, window_bounds = array<i64: 32, 32>}, {pipeline_mode = #tpu.pipeline_mode<synchronous>, transform_indices = @transform_7, window_bounds = array<i64: 32, 32>}, {pipeline_mode = #tpu.pipeline_mode<synchronous>, transform_indices = @transform_8, window_bounds = array<i64: 32, 32>}, {pipeline_mode = #tpu.pipeline_mode<synchronous>, transform_indices = @transform_9, window_bounds = array<i64: 32, 32>}, {pipeline_mode = #tpu.pipeline_mode<synchronous>, transform_indices = @transform_10, window_bounds = array<i64: 32, 1>}, {transform_indices = @transform_11, window_bounds = array<i64: 32, 128>}]} {
    %c0 = arith.constant 0 : index
    %c0_0 = arith.constant 0 : index
    %0 = vector.load %arg2[%c0, %c0_0] : memref<96x128xbf16, #tpu.memory_space<vmem>>, vector<96x128xbf16>
    %1 = vector.extract_strided_slice %0 {offsets = [0, 0], sizes = [32, 128], strides = [1, 1]} : vector<96x128xbf16> to vector<32x128xbf16>
    %2 = vector.extract_strided_slice %0 {offsets = [32, 0], sizes = [64, 128], strides = [1, 1]} : vector<96x128xbf16> to vector<64x128xbf16>
    %c0_1 = arith.constant 0 : index
    %c0_2 = arith.constant 0 : index
    %3 = vector.load %arg4[%c0_1, %c0_2] : memref<32x1xf32, #tpu.memory_space<vmem>>, vector<32x1xf32>
    %c0_3 = arith.constant 0 : index
    %c0_4 = arith.constant 0 : index
    %4 = vector.load %arg3[%c0_3, %c0_4] : memref<1x128xf32, #tpu.memory_space<vmem>>, vector<1x128xf32>
    %5 = vector.broadcast %3 : vector<32x1xf32> to vector<32x128xf32>
    %6 = vector.broadcast %4 : vector<1x128xf32> to vector<32x128xf32>
    %7 = arith.mulf %5, %6 : vector<32x128xf32>
    %cst = arith.constant 0.000000e+00 : f32
    %8 = vector.broadcast %cst : f32 to vector<32x128xf32>
    %9 = arith.maximumf %7, %8 : vector<32x128xf32>
    %c0_5 = arith.constant 0 : index
    %c0_6 = arith.constant 0 : index
    %10 = vector.load %arg5[%c0_5, %c0_6] : memref<32x64xbf16, #tpu.memory_space<vmem>>, vector<32x64xbf16>
    %cst_7 = arith.constant dense<0.000000e+00> : vector<32x128xf32>
    %11 = tpu.matmul %10, %2, %cst_7 {dimension_numbers = #tpu.dot_dimension_numbers<[1], [0], [0], [1], [0, 0, 1, 1], [], []>} : vector<32x64xbf16>, vector<64x128xbf16>, vector<32x128xf32> -> vector<32x128xf32>
    %c0_8 = arith.constant 0 : index
    %c0_9 = arith.constant 0 : index
    %12 = vector.load %arg6[%c0_8, %c0_9] : memref<32x1xf32, #tpu.memory_space<vmem>>, vector<32x1xf32>
    %13 = vector.broadcast %12 : vector<32x1xf32> to vector<32x128xf32>
    %14 = arith.addf %11, %13 : vector<32x128xf32>
    %cst_10 = arith.constant 0.000000e+00 : f32
    %15 = vector.broadcast %cst_10 : f32 to vector<32x128xf32>
    %16 = arith.maximumf %14, %15 : vector<32x128xf32>
    %c0_11 = arith.constant 0 : index
    %c0_12 = arith.constant 0 : index
    %17 = vector.load %arg7[%c0_11, %c0_12] : memref<32x32xbf16, #tpu.memory_space<vmem>>, vector<32x32xbf16>
    %c0_13 = arith.constant 0 : index
    %c0_14 = arith.constant 0 : index
    %18 = vector.load %arg1[%c0_13, %c0_14] : memref<32x128xbf16, #tpu.memory_space<vmem>>, vector<32x128xbf16>
    %cst_15 = arith.constant dense<0.000000e+00> : vector<32x128xf32>
    %19 = tpu.matmul %17, %18, %cst_15 {dimension_numbers = #tpu.dot_dimension_numbers<[1], [0], [0], [1], [0, 0, 1, 1], [], []>} : vector<32x32xbf16>, vector<32x128xbf16>, vector<32x128xf32> -> vector<32x128xf32>
    %c0_16 = arith.constant 0 : index
    %c0_17 = arith.constant 0 : index
    %20 = vector.load %arg8[%c0_16, %c0_17] : memref<32x32xbf16, #tpu.memory_space<vmem>>, vector<32x32xbf16>
    %cst_18 = arith.constant dense<0.000000e+00> : vector<32x128xf32>
    %21 = tpu.matmul %20, %1, %cst_18 {dimension_numbers = #tpu.dot_dimension_numbers<[1], [0], [0], [1], [0, 0, 1, 1], [], []>} : vector<32x32xbf16>, vector<32x128xbf16>, vector<32x128xf32> -> vector<32x128xf32>
    %22 = arith.addf %19, %21 : vector<32x128xf32>
    %c0_19 = arith.constant 0 : index
    %c0_20 = arith.constant 0 : index
    %23 = vector.load %arg9[%c0_19, %c0_20] : memref<32x32xbf16, #tpu.memory_space<vmem>>, vector<32x32xbf16>
    %24 = arith.truncf %9 : vector<32x128xf32> to vector<32x128xbf16>
    %cst_21 = arith.constant dense<0.000000e+00> : vector<32x128xf32>
    %25 = tpu.matmul %23, %24, %cst_21 {dimension_numbers = #tpu.dot_dimension_numbers<[1], [0], [0], [1], [0, 0, 1, 1], [], []>} : vector<32x32xbf16>, vector<32x128xbf16>, vector<32x128xf32> -> vector<32x128xf32>
    %26 = arith.addf %22, %25 : vector<32x128xf32>
    %c0_22 = arith.constant 0 : index
    %c0_23 = arith.constant 0 : index
    %27 = vector.load %arg10[%c0_22, %c0_23] : memref<32x32xbf16, #tpu.memory_space<vmem>>, vector<32x32xbf16>
    %28 = arith.truncf %16 : vector<32x128xf32> to vector<32x128xbf16>
    %cst_24 = arith.constant dense<0.000000e+00> : vector<32x128xf32>
    %29 = tpu.matmul %27, %28, %cst_24 {dimension_numbers = #tpu.dot_dimension_numbers<[1], [0], [0], [1], [0, 0, 1, 1], [], []>} : vector<32x32xbf16>, vector<32x128xbf16>, vector<32x128xf32> -> vector<32x128xf32>
    %30 = arith.addf %26, %29 : vector<32x128xf32>
    %c0_25 = arith.constant 0 : index
    %c0_26 = arith.constant 0 : index
    %31 = vector.load %arg11[%c0_25, %c0_26] : memref<32x1xf32, #tpu.memory_space<vmem>>, vector<32x1xf32>
    %32 = vector.broadcast %31 : vector<32x1xf32> to vector<32x128xf32>
    %33 = arith.addf %30, %32 : vector<32x128xf32>
    %34 = arith.truncf %33 : vector<32x128xf32> to vector<32x128xbf16>
    %c0_27 = arith.constant 0 : index
    %c0_28 = arith.constant 0 : index
    %35 = vector.load %arg12[%c0_27, %c0_28] : memref<32x128xbf16, #tpu.memory_space<vmem>>, vector<32x128xbf16>
    tpu.vector_store %arg12[%c0_27, %c0_28], %34 {strides = array<i32>} : memref<32x128xbf16, #tpu.memory_space<vmem>>, vector<32x128xbf16>,
    return
  }
  func.func @transform_0(%arg0: i32) -> (i32, i32) {
    %c0_i32 = arith.constant 0 : i32
    %c0_i32_0 = arith.constant 0 : i32
    return %c0_i32, %arg0 : i32, i32
  }
  func.func @transform_1(%arg0: i32) -> (i32, i32) {
    %c0_i32 = arith.constant 0 : i32
    %c0_i32_0 = arith.constant 0 : i32
    return %c0_i32, %arg0 : i32, i32
  }
  func.func @transform_2(%arg0: i32) -> (i32, i32) {
    %c0_i32 = arith.constant 0 : i32
    %c0_i32_0 = arith.constant 0 : i32
    return %c0_i32, %arg0 : i32, i32
  }
  func.func @transform_3(%arg0: i32) -> (i32, i32) {
    %c0_i32 = arith.constant 0 : i32
    %c0_i32_0 = arith.constant 0 : i32
    %c0_i32_1 = arith.constant 0 : i32
    return %c0_i32, %c0_i32_0 : i32, i32
  }
  func.func @transform_4(%arg0: i32) -> (i32, i32) {
    %c0_i32 = arith.constant 0 : i32
    %c0_i32_0 = arith.constant 0 : i32
    %c0_i32_1 = arith.constant 0 : i32
    return %c0_i32, %c0_i32_0 : i32, i32
  }
  func.func @transform_5(%arg0: i32) -> (i32, i32) {
    %c0_i32 = arith.constant 0 : i32
    %c0_i32_0 = arith.constant 0 : i32
    %c0_i32_1 = arith.constant 0 : i32
    return %c0_i32, %c0_i32_0 : i32, i32
  }
  func.func @transform_6(%arg0: i32) -> (i32, i32) {
    %c0_i32 = arith.constant 0 : i32
    %c0_i32_0 = arith.constant 0 : i32
    %c0_i32_1 = arith.constant 0 : i32
    return %c0_i32, %c0_i32_0 : i32, i32
  }
  func.func @transform_7(%arg0: i32) -> (i32, i32) {
    %c0_i32 = arith.constant 0 : i32
    %c0_i32_0 = arith.constant 0 : i32
    %c0_i32_1 = arith.constant 0 : i32
    return %c0_i32, %c0_i32_0 : i32, i32
  }
  func.func @transform_8(%arg0: i32) -> (i32, i32) {
    %c0_i32 = arith.constant 0 : i32
    %c0_i32_0 = arith.constant 0 : i32
    %c0_i32_1 = arith.constant 0 : i32
    return %c0_i32, %c0_i32_0 : i32, i32
  }
  func.func @transform_9(%arg0: i32) -> (i32, i32) {
    %c0_i32 = arith.constant 0 : i32
    %c0_i32_0 = arith.constant 0 : i32
    %c0_i32_1 = arith.constant 0 : i32
    return %c0_i32, %c0_i32_0 : i32, i32
  }
  func.func @transform_10(%arg0: i32) -> (i32, i32) {
    %c0_i32 = arith.constant 0 : i32
    %c0_i32_0 = arith.constant 0 : i32
    %c0_i32_1 = arith.constant 0 : i32
    return %c0_i32, %c0_i32_0 : i32, i32
  }
  func.func @transform_11(%arg0: i32) -> (i32, i32) {
    %c0_i32 = arith.constant 0 : i32
    %c0_i32_0 = arith.constant 0 : i32
    return %c0_i32, %arg0 : i32, i32
  }
}

</mosaic_0001>

<bundles_post_ra>
// kernel: tpu_custom_call.1
= control target key start
LH: loop header
LB: loop body
LE: loop exit
PB: predicated region body
PF: predicated region fallthrough
CT: control target
= control target key end

     0   :  { %v534_v1 = vmov 0   ;;  %vm149_vm0 = vcmask 523264   ;;  %vm213_vm1 = vcmask 261120   ;;  %s704_s1 = inlined_call_operand.vmem [shape: bf16[96,16], index: 1, kind: input, shape index: {}]   ;;  %s705_s3 = inlined_call_operand.vmem [shape: f32[32,1], index: 3, kind: input, shape index: {}]   ;;  %s706_s5 = inlined_call_operand.vmem [shape: f32[32,1], index: 5, kind: input, shape index: {}]   ;;  %s707_s2 = inlined_call_operand.vmem [shape: f32[1,16], index: 2, kind: input, shape index: {}]   ;;  %s708_s4 = inlined_call_operand.vmem [shape: bf16[32,64], index: 4, kind: input, shape index: {}]   ;;  %s709_s10 = inlined_call_operand.vmem [shape: f32[32,1], index: 10, kind: input, shape index: {}]   ;;  %s710_s7 = inlined_call_operand.vmem [shape: bf16[32,32], index: 7, kind: input, shape index: {}]   ;;  %s711_s0 = inlined_call_operand.vmem [shape: bf16[32,16], index: 0, kind: input, shape index: {}]   ;;  %s712_s6 = inlined_call_operand.vmem [shape: bf16[32,32], index: 6, kind: input, shape index: {}]   ;;  %s713_s8 = inlined_call_operand.vmem [shape: bf16[32,32], index: 8, kind: input, shape index: {}]   ;;  %s714_s9 = inlined_call_operand.vmem [shape: bf16[32,32], index: 9, kind: input, shape index: {}]   ;;  %s715_s11 = inlined_call_operand.vmem [shape: bf16[32,16], index: 11, kind: output, shape index: {}]  }
   0x1   :  { %v503_v0 = vld [vmem:[%s704_s1 + $0x28] sm:$0xff]  ;;  %530 = vset.pattern.permute.xlu0 %v534_v1  ;;  %v53_v2 = vld [vmem:[%s705_s3 + $0x10] sm:$0xff]  ;;  %531 = vset.pattern.permute.xlu1 %v534_v1  ;;  %v51_v3 = vld [vmem:[%s705_s3] sm:$0xff] }
   0x2   :  { %68 = vperm.xlu0 %530, %v53_v2   ;;  %532 = vset.pattern.permute.xlu2 %v534_v1  ;;  %v502_v4 = vld [vmem:[%s704_s1 + $0x20] sm:$0xff]  ;;  %v93_v5 = vld [vmem:[%s706_s5 + $0x10] sm:$0xff]  ;;  %v501_v6 = vld [vmem:[%s704_s1 + $0x18] sm:$0xff] }
   0x3   :  { %160 = vmatpush.bf16.msra.mxu0 %v503_v0  ;;  %58 = vperm.xlu1 %531, %v51_v3   ;;  %v54_v7 = vld [vmem:[%s705_s3 + $0x18] sm:$0xff]  ;;  %v499_v8 = vld [vmem:[%s704_s1 + $0x8] sm:$0xff]  ;;  %v500_v10 = vld [vmem:[%s704_s1 + $0x10] sm:$0xff] }
   0x4   :  { %107 = vperm.xlu2 %532, %v93_v5   ;;  %v52_v9 = vld [vmem:[%s705_s3 + $0x8] sm:$0xff]  ;;  %527 = vmatpush.bf16.msra.mxu2 %v499_v8  ;;  %v94_v11 = vld [vmem:[%s706_s5 + $0x18] sm:$0xff]  ;;  %v504_v12 = vld [vmem:[%s708_s4] sm:$0xff] }
   0x5   :  { %226 = vmatpush.bf16.msra.mxu1 %v499_v8  ;;  %v91_v13 = vld [vmem:[%s706_s5] sm:$0xff]  ;;  %v92_v14 = vld [vmem:[%s706_s5 + $0x8] sm:$0xff]  ;;  %v378_v17 = vld [vmem:[%s709_s10 + $0x10] sm:$0xff] }
   0x6   :  { %v376_v15 = vld [vmem:[%s709_s10] sm:$0xff]  ;;  %v377_v16 = vld [vmem:[%s709_s10 + $0x8] sm:$0xff]  ;;  %v379_v18 = vld [vmem:[%s709_s10 + $0x18] sm:$0xff] }
   0x7   :  { %161 = vmatpush.bf16.msra.mxu0 %v502_v4  ;;  %v505_v19 = vld [vmem:[%s708_s4 + $0x8] sm:$0xff]  ;;  %v498_v20 = vld [vmem:[%s704_s1] sm:$0xff] }
   0x8   :  { %528 = vmatpush.bf16.msra.mxu2 %v498_v20  ;;  %v511_v21 = vld [vmem:[%s710_s7 + $0x8] sm:$0xff]  ;;  %v508_v23 = vld [vmem:[%s711_s0] sm:$0xff] }
   0x9   :  { %227 = vmatpush.bf16.msra.mxu1 %v498_v20  ;;  %v509_v22 = vld [vmem:[%s711_s0 + $0x8] sm:$0xff]  ;;  %v506_v24 = vld [vmem:[%s712_s6] sm:$0xff] }
   0xa   :  { %73 = vperm.xlu0 %530, %v54_v7   ;;  %v507_v25 = vld [vmem:[%s712_s6 + $0x8] sm:$0xff]  ;;  %v533_v27 = vld [vmem:[%s707_s2] ss:$0 sm:$0xff] }
   0xb   :  { %162 = vmatpush.bf16.msra.mxu0 %v501_v6  ;;  %63 = vperm.xlu1 %531, %v52_v9   ;;  %v510_v31 = vld [vmem:[%s710_s7] sm:$0xff]  ;;  %v513_v44 = vld [vmem:[%s713_s8 + $0x8] sm:$0xff] }
   0xc   :  { %112 = vperm.xlu2 %532, %v94_v11   ;;  %459 = vmatmul.msk.bf16.vlgmr.msra.gmra.mxu2 %vm213_vm1, %v511_v21  ;;  %v512_v42 = vld [vmem:[%s713_s8] sm:$0xff]  ;;  %v515_v63 = vld [vmem:[%s714_s9 + $0x8] sm:$0xff] }
   0xd   :  { %273 = vmatpush.bf16.msrb.mxu2 %v509_v22  ;;  %458 = vmatmul.msk.bf16.vlgmr.msra.gmra.mxu1 %vm213_vm1, %v510_v31  ;;  %v514_v62 = vld [vmem:[%s714_s9] sm:$0xff] }
   0xf   :  { %163 = vmatpush.bf16.msra.mxu0 %v500_v10 }
  0x11   :  { %274 = vmatpush.bf16.msrb.mxu2 %v508_v23 }
  0x12   :  { %440 = vmatmul.msk.bf16.vlgmr.msra.gmra.mxu0 %vm149_vm0, %v504_v12  ;;  %97 = vperm.xlu0 %530, %v91_v13  }
  0x13   :  { %102 = vperm.xlu1 %531, %v92_v14  }
  0x14   :  { %382 = vperm.xlu2 %532, %v376_v15  }
  0x1a   :  { %387 = vperm.xlu0 %530, %v377_v16  }
  0x1b   :  { %392 = vperm.xlu1 %531, %v378_v17  }
  0x1c   :  { %397 = vperm.xlu2 %532, %v379_v18   ;;  %476 = vmatmul.msk.bf16.vlgmr.msrb.gmra.mxu2 %vm213_vm1, %v506_v24 }
  0x22   :  { %441 = vmatmul.msk.bf16.gmra.mxu0 %vm149_vm0, %v505_v19 }
  0x2c   :  { %477 = vmatmul.msk.bf16.gmra.mxu2 %vm213_vm1, %v507_v25 }
  0x5e   :  { %v108_v46 = vpop.permute.xlu2 %107 }
  0x66   :  { %v113_v48 = vpop.permute.xlu2 %112 }
  0x6e   :  { %v383_v16 = vpop.permute.xlu2 %382 }
  0x74   :  { %v69_v26 = vpop.permute.xlu0 %68 }
  0x75   :  { %v59_v28 = vpop.permute.xlu1 %58  ;;  %v81_v29 = vmul.f32 %v533_v27, %v69_v26 }
  0x76   :  { %v79_v30 = vmul.f32 %v533_v27, %v59_v28 }
  0x77   :  { %v85_v33 = vmax.f32 %v81_v29, 0.0 }
  0x78   :  { %v83_v37 = vmax.f32 %v79_v30, 0.0 }
  0x7c   :  { %v74_v32 = vpop.permute.xlu0 %73 }
  0x7d   :  { %v82_v34 = vmul.f32 %v533_v27, %v74_v32  ;;  %v64_v35 = vpop.permute.xlu1 %63 }
  0x7e   :  { %v80_v36 = vmul.f32 %v533_v27, %v64_v35 }
  0x7f   :  { %v86_v38 = vmax.f32 %v82_v34, 0.0 }
  0x80   :  { %v84_v39 = vmax.f32 %v80_v36, 0.0 }
  0x81   :  { %v291_v40 = vpack.c.bf16 %v86_v38, %v85_v33  ;;  %v398_v33 = vpop.permute.xlu2 %397 }
  0x82   :  { %v290_v41 = vpack.c.bf16 %v84_v39, %v83_v37 }
  0x83   :  { %314 = vmatpush.bf16.msra.mxu3 %v291_v40 }
  0x84   :  { %v98_v49 = vpop.permute.xlu0 %97 }
  0x85   :  { %v103_v51 = vpop.permute.xlu1 %102 }
  0x87   :  { %315 = vmatpush.bf16.msra.mxu3 %v290_v41 }
  0x8a   :  { %486 = vmatmul.msk.bf16.vlgmr.msra.gmra.mxu3 %vm213_vm1, %v512_v42  ;;  %v229_v2 = vpop.f32.mrf.mxu1 }
  0x8c   :  { %v388_v18 = vpop.permute.xlu0 %387 }
  0x8d   :  { %v393_v34 = vpop.permute.xlu1 %392 }
  0x8f   :  { %v165_v43 = vpop.f32.mrf.mxu0  ;;  %v234_v0 = vpop.f32.mrf.mxu2 }
  0x90   :  { %v166_v55 = vadd.f32 %v165_v43, %v98_v49 }
  0x92   :  { %v175_v60 = vmax.f32 %v166_v55, 0.0  ;;  %v231_v5 = vpop.f32.mrf.mxu1 }
  0x97   :  { %v167_v45 = vpop.f32.mrf.mxu0  ;;  %v236_v1 = vpop.f32.mrf.mxu2 }
  0x98   :  { %v168_v53 = vadd.f32 %v167_v45, %v103_v51 }
  0x9a   :  { %487 = vmatmul.msk.bf16.gmra.mxu3 %vm213_vm1, %v513_v44  ;;  %v176_v58 = vmax.f32 %v168_v53, 0.0 }
  0x9c   :  { %v335_v61 = vpack.c.bf16 %v176_v58, %v175_v60 }
  0x9f   :  { %v170_v47 = vpop.f32.mrf.mxu0  ;;  %v276_v3 = vpop.f32.mrf.mxu2 }
  0xa0   :  { %v171_v50 = vadd.f32 %v170_v47, %v108_v46  ;;  %v277_v9 = vadd.f32 %v276_v3, %v229_v2 }
  0xa2   :  { %v177_v56 = vmax.f32 %v171_v50, 0.0 }
  0xa7   :  { %v172_v52 = vpop.f32.mrf.mxu0  ;;  %v278_v6 = vpop.f32.mrf.mxu2 }
  0xa8   :  { %v173_v54 = vadd.f32 %v172_v52, %v113_v48  ;;  %v279_v10 = vadd.f32 %v278_v6, %v231_v5 }
  0xaa   :  { %v178_v57 = vmax.f32 %v173_v54, 0.0 }
  0xac   :  { %v336_v59 = vpack.c.bf16 %v178_v57, %v177_v56 }
  0xae   :  { %359 = vmatpush.bf16.msrb.mxu1 %v336_v59 }
  0xaf   :  { %v281_v14 = vpop.f32.mrf.mxu2 }
  0xb0   :  { %v282_v24 = vadd.f32 %v281_v14, %v234_v0 }
  0xb2   :  { %360 = vmatpush.bf16.msrb.mxu1 %v335_v61 }
  0xb5   :  { %496 = vmatmul.msk.bf16.vlgmr.msrb.gmra.mxu1 %vm213_vm1, %v514_v62 }
  0xb7   :  { %v283_v25 = vpop.f32.mrf.mxu2 }
  0xb8   :  { %v284_v28 = vadd.f32 %v283_v25, %v236_v1 }
  0xc5   :  { %497 = vmatmul.msk.bf16.gmra.mxu1 %vm213_vm1, %v515_v63 }
 0x10d   :  { %v317_v4 = vpop.f32.mrf.mxu3 }
 0x10e   :  { %v327_v11 = vadd.f32 %v317_v4, %v277_v9 }
 0x115   :  { %v319_v7 = vpop.f32.mrf.mxu3 }
 0x116   :  { %v328_v13 = vadd.f32 %v319_v7, %v279_v10 }
 0x11d   :  { %v322_v19 = vpop.f32.mrf.mxu3 }
 0x11e   :  { %v329_v27 = vadd.f32 %v322_v19, %v282_v24 }
 0x125   :  { %v324_v26 = vpop.f32.mrf.mxu3 }
 0x126   :  { %v330_v29 = vadd.f32 %v324_v26, %v284_v28 }
 0x132   :  { %v362_v8 = vpop.f32.mrf.mxu1 }
 0x133   :  { %v372_v12 = vadd.f32 %v362_v8, %v327_v11 }
 0x135   :  { %v400_v20 = vadd.f32 %v383_v16, %v372_v12 }
 0x13a   :  { %v364_v15 = vpop.f32.mrf.mxu1 }
 0x13b   :  { %v373_v17 = vadd.f32 %v364_v15, %v328_v13 }
 0x13d   :  { %v401_v21 = vadd.f32 %v388_v18, %v373_v17 }
 0x13f   :  { %v519_v22 = vpack.c.bf16 %v401_v21, %v400_v20 }
 0x141   :  { %520 = vst [vmem:[%s715_s11] sm:$0xff] %v519_v22  }
 0x142   :  { %v367_v23 = vpop.f32.mrf.mxu1 }
 0x143   :  { %v374_v30 = vadd.f32 %v367_v23, %v329_v27 }
 0x145   :  { %v402_v35 = vadd.f32 %v393_v34, %v374_v30 }
 0x14a   :  { %v369_v31 = vpop.f32.mrf.mxu1 }
 0x14b   :  { %v375_v32 = vadd.f32 %v369_v31, %v330_v29 }
 0x14d   :  { %v403_v36 = vadd.f32 %v398_v33, %v375_v32 }
 0x14f   :  { %v524_v37 = vpack.c.bf16 %v403_v36, %v402_v35 }
 0x151   :  { %526 = vst [vmem:[%s715_s11 + $0x8] sm:$0xff] %v524_v37  }

</bundles_post_ra>
